<compile_context>
chip_gen: v7x
topology: tpu7x:2x2x1
jax: 0.10.0
libtpu: 0.0.40
codegen_flags: <defaults>
</compile_context>

<pallas_src>
import functools

import jax
import jax.numpy as jnp
import numpy as np
from jax.experimental import pallas as pl
from jax.experimental.pallas import tpu as pltpu


def _focal_softmax_kernel(x_ref, tgt_ref, at_ref, out_ref, *, gamma, use_alpha):
    """Per-sample focal loss for a (TILE_N, C) block of logits.

    loss_i = -(1 - p_{i,t_i})**gamma * alpha[t_i] * log p_{i,t_i},
    p = softmax(x, axis=-1).
    """
    x = x_ref[...].astype(jnp.float32)            # (TILE_N, C)
    tgt = tgt_ref[...]                            # (TILE_N, 1) int32

    # Numerically stable log-softmax pieces (no full softmax p materialized).
    m = jnp.max(x, axis=-1, keepdims=True)        # (TILE_N, 1)  [XLU]
    z = x - m                                     # (TILE_N, C)
    denom = jnp.sum(jnp.exp(z), axis=-1, keepdims=True)   # (TILE_N, 1) [EUP+XLU]
    log_denom = jnp.log(denom)                    # (TILE_N, 1)

    # Gather z at the target via a one-hot lane mask (no in-kernel gather op).
    col = jax.lax.broadcasted_iota(jnp.int32, x.shape, 1)  # (TILE_N, C)
    one_hot = col == tgt                                   # (TILE_N, C) bool
    zt = jnp.sum(jnp.where(one_hot, z, 0.0), axis=-1, keepdims=True)  # (TILE_N,1)

    logpt = zt - log_denom                        # log p_t  (<= 0)
    pt = jnp.exp(logpt)                           # p_t      (<= 1, no clamp NaN hazard)

    if use_alpha:
        logpt = logpt * at_ref[...]               # alpha[target], gathered in wrapper

    one_minus_pt = jnp.maximum(1.0 - pt, 0.0)     # belt-and-suspenders clamp
    g = float(gamma)
    if g == 0.0:
        mod = jnp.ones_like(one_minus_pt)
    elif g == 1.0:
        mod = one_minus_pt
    elif g == 2.0:
        mod = one_minus_pt * one_minus_pt
    elif g.is_integer() and 0.0 < g <= 4.0:
        mod = one_minus_pt ** int(g)
    else:
        mod = one_minus_pt ** g

    loss = -(mod * logpt)                         # (TILE_N, 1)
    out_ref[...] = loss.reshape(1, -1)            # lane-dense (1, TILE_N) store


def _choose_tile_n(n, c, vmem_budget_bytes=24 * 1024 * 1024):
    """Pick TILE_N (multiple of 128) so double-buffered inputs fit comfortably
    in the default scoped VMEM limit on every generation (incl. v7x 64 MiB)."""
    per_row_bytes = (c + 2) * 4            # f32 logits row + i32 target + f32 alpha_t
    max_rows = vmem_budget_bytes // (2 * per_row_bytes)   # 2x for double buffering
    tile = min(1024, int(max_rows))
    tile = max(128, (tile // 128) * 128)
    n_pad_min = pl.cdiv(n, 128) * 128
    return min(tile, n_pad_min)


def focal_loss_softmax(logits, target, alpha=None, gamma=0.0, reduction="none",
                       tile_n=None):
    """JAX/Pallas equivalent of FocalLossSoftmax.forward.

    logits: (N, C) float, target: (N,) int, alpha: optional (C,) float.
    """
    N, C = logits.shape
    use_alpha = alpha is not None
    tgt = target.astype(jnp.int32)

    if use_alpha:
        alpha_arr = jnp.asarray(alpha, dtype=jnp.float32).reshape(C)
        at = alpha_arr[tgt]                                  # (N,) gather in wrapper
    else:
        at = jnp.ones((N,), dtype=jnp.float32)

    TILE_N = _choose_tile_n(N, C) if tile_n is None else int(tile_n)
    n_tiles = pl.cdiv(N, TILE_N)
    n_pad = n_tiles * TILE_N
    pad = n_pad - N
    if pad:
        logits_p = jnp.pad(logits, ((0, pad), (0, 0)))
        tgt_p = jnp.pad(tgt, (0, pad))
        at_p = jnp.pad(at, (0, pad))
    else:
        logits_p, tgt_p, at_p = logits, tgt, at

    tgt2d = tgt_p.reshape(n_pad, 1)
    at2d = at_p.reshape(n_pad, 1)

    kernel = functools.partial(
        _focal_softmax_kernel, gamma=float(gamma), use_alpha=use_alpha
    )

    out = pl.pallas_call(
        kernel,
        out_shape=jax.ShapeDtypeStruct((1, n_pad), jnp.float32),
        grid=(n_tiles,),
        in_specs=[
            pl.BlockSpec((TILE_N, C), lambda i: (i, 0)),   # logits tile
            pl.BlockSpec((TILE_N, 1), lambda i: (i, 0)),   # target tile
            pl.BlockSpec((TILE_N, 1), lambda i: (i, 0)),   # alpha[target] tile
        ],
        out_specs=pl.BlockSpec((1, TILE_N), lambda i: (0, i)),
        compiler_params=pltpu.CompilerParams(
            dimension_semantics=("parallel",),             # megacore on v7x
            vmem_limit_bytes=48 * 1024 * 1024,             # headroom on all gens
        ),
    )(logits_p, tgt2d, at2d)

    loss = out.reshape(n_pad)[:N]   # per-sample loss, matches reduction='none'
    if reduction == "none":
        return loss
    if reduction == "mean":
        return jnp.mean(loss)
    if reduction == "sum":
        return jnp.sum(loss)
    raise NotImplementedError(reduction)


def _reference(logits, target, alpha, gamma):
    """Pure-JAX reference mirroring the PyTorch forward (reduction='none')."""
    p = jax.nn.softmax(logits.astype(jnp.float32), axis=-1)
    logp = jax.nn.log_softmax(logits.astype(jnp.float32), axis=-1)
    pt = jnp.take_along_axis(p, target[:, None], axis=1)[:, 0]
    logpt = jnp.take_along_axis(logp, target[:, None], axis=1)[:, 0]
    if alpha is not None:
        a = jnp.asarray(alpha, jnp.float32)[target]
        logpt = logpt * a
    return -((1.0 - pt) ** gamma) * logpt


if __name__ == "__main__":
    # Small deterministic example consistent with the module: input (N, C), target (N,)
    N, C = 8, 7
    gamma = 2.0
    alpha = [1.0, 0.5, 2.0, 1.5, 0.25, 1.0, 3.0]  # deterministic (C,) weights

    key = jax.random.PRNGKey(0)
    kx, kt = jax.random.split(key)
    logits = jax.random.normal(kx, (N, C), dtype=jnp.float32)
    target = jax.random.randint(kt, (N,), 0, C, dtype=jnp.int32)

    # Case 1: alpha + gamma=2, reduction='none' (module default behaviour).
    loss = focal_loss_softmax(logits, target, alpha=alpha, gamma=gamma,
                              reduction="none")
    loss = jax.block_until_ready(loss)
    ref = _reference(logits, target, alpha, gamma)
    np.testing.assert_allclose(np.asarray(loss), np.asarray(ref),
                               rtol=1e-5, atol=1e-5)

    # Case 2: no alpha, gamma=0 (plain NLL of softmax), exercises that branch.
    loss2 = focal_loss_softmax(logits, target, alpha=None, gamma=0.0,
                               reduction="none")
    loss2 = jax.block_until_ready(loss2)
    ref2 = _reference(logits, target, None, 0.0)
    np.testing.assert_allclose(np.asarray(loss2), np.asarray(ref2),
                               rtol=1e-5, atol=1e-5)

    print("KERNEL_OK")
</pallas_src>

<mosaic_0001>
module attributes {stable_mosaic.version = 11 : i64} {
  func.func @_focal_softmax_kernel(%arg0: i32, %arg1: memref<128x7xf32, #tpu.memory_space<vmem>>, %arg2: memref<128x1xi32, #tpu.memory_space<vmem>>, %arg3: memref<128x1xf32, #tpu.memory_space<vmem>>, %arg4: memref<1x128xf32, #tpu.memory_space<vmem>>) attributes {dimension_semantics = [#tpu.dimension_semantics<parallel>], iteration_bounds = array<i64: 1>, scalar_prefetch = 0 : i64, scratch_operands = 0 : i64, tpu.core_type = #tpu.core_type<tc>, window_params = [{transform_indices = @transform_0, window_bounds = array<i64: 128, 7>}, {transform_indices = @transform_1, window_bounds = array<i64: 128, 1>}, {transform_indices = @transform_2, window_bounds = array<i64: 128, 1>}, {transform_indices = @transform_3, window_bounds = array<i64: 1, 128>}]} {
    %c0 = arith.constant 0 : index
    %c0_0 = arith.constant 0 : index
    %0 = vector.load %arg1[%c0, %c0_0] : memref<128x7xf32, #tpu.memory_space<vmem>>, vector<128x7xf32>
    %c0_1 = arith.constant 0 : index
    %c0_2 = arith.constant 0 : index
    %1 = vector.load %arg2[%c0_1, %c0_2] : memref<128x1xi32, #tpu.memory_space<vmem>>, vector<128x1xi32>
    %cst = arith.constant dense<0xFF800000> : vector<128xf32>
    %2 = vector.multi_reduction <maximumf>, %0, %cst [1] : vector<128x7xf32> to vector<128xf32>
    %3 = vector.shape_cast %2 : vector<128xf32> to vector<128x1xf32>
    %4 = vector.broadcast %3 : vector<128x1xf32> to vector<128x7xf32>
    %5 = arith.subf %0, %4 : vector<128x7xf32>
    %6 = math.exp %5 : vector<128x7xf32>
    %cst_3 = arith.constant dense<0.000000e+00> : vector<128xf32>
    %7 = vector.multi_reduction <add>, %6, %cst_3 [1] : vector<128x7xf32> to vector<128xf32>
    %8 = vector.shape_cast %7 : vector<128xf32> to vector<128x1xf32>
    %9 = math.log %8 : vector<128x1xf32>
    %10 = tpu.iota {dimensions = array<i32: 1>} : vector<128x7xi32>
    %11 = vector.broadcast %1 : vector<128x1xi32> to vector<128x7xi32>
    %12 = arith.cmpi eq, %10, %11 : vector<128x7xi32>
    %cst_4 = arith.constant 0.000000e+00 : f32
    %13 = vector.broadcast %cst_4 : f32 to vector<128x7xf32>
    %14 = arith.select %12, %5, %13 : vector<128x7xi1>, vector<128x7xf32>
    %cst_5 = arith.constant dense<0.000000e+00> : vector<128xf32>
    %15 = vector.multi_reduction <add>, %14, %cst_5 [1] : vector<128x7xf32> to vector<128xf32>
    %16 = vector.shape_cast %15 : vector<128xf32> to vector<128x1xf32>
    %17 = arith.subf %16, %9 : vector<128x1xf32>
    %18 = math.exp %17 : vector<128x1xf32>
    %c0_6 = arith.constant 0 : index
    %c0_7 = arith.constant 0 : index
    %19 = vector.load %arg3[%c0_6, %c0_7] : memref<128x1xf32, #tpu.memory_space<vmem>>, vector<128x1xf32>
    %20 = arith.mulf %17, %19 : vector<128x1xf32>
    %cst_8 = arith.constant 1.000000e+00 : f32
    %21 = vector.broadcast %cst_8 : f32 to vector<128x1xf32>
    %22 = arith.subf %21, %18 : vector<128x1xf32>
    %cst_9 = arith.constant 0.000000e+00 : f32
    %23 = vector.broadcast %cst_9 : f32 to vector<128x1xf32>
    %24 = arith.maximumf %22, %23 : vector<128x1xf32>
    %25 = arith.mulf %24, %24 : vector<128x1xf32>
    %26 = arith.mulf %25, %20 : vector<128x1xf32>
    %cst_10 = arith.constant 0.000000e+00 : f32
    %27 = vector.broadcast %cst_10 : f32 to vector<128x1xf32>
    %28 = arith.subf %27, %26 : vector<128x1xf32>
    %29 = vector.shape_cast %28 : vector<128x1xf32> to vector<1x128xf32>
    %c0_11 = arith.constant 0 : index
    %c0_12 = arith.constant 0 : index
    %30 = vector.load %arg4[%c0_11, %c0_12] : memref<1x128xf32, #tpu.memory_space<vmem>>, vector<1x128xf32>
    tpu.vector_store %arg4[%c0_11, %c0_12], %29 {strides = array<i32>} : memref<1x128xf32, #tpu.memory_space<vmem>>, vector<1x128xf32>,
    return
  }
  func.func @transform_0(%arg0: i32) -> (i32, i32) {
    %c0_i32 = arith.constant 0 : i32
    %c0_i32_0 = arith.constant 0 : i32
    return %arg0, %c0_i32 : i32, i32
  }
  func.func @transform_1(%arg0: i32) -> (i32, i32) {
    %c0_i32 = arith.constant 0 : i32
    %c0_i32_0 = arith.constant 0 : i32
    return %arg0, %c0_i32 : i32, i32
  }
  func.func @transform_2(%arg0: i32) -> (i32, i32) {
    %c0_i32 = arith.constant 0 : i32
    %c0_i32_0 = arith.constant 0 : i32
    return %arg0, %c0_i32 : i32, i32
  }
  func.func @transform_3(%arg0: i32) -> (i32, i32) {
    %c0_i32 = arith.constant 0 : i32
    %c0_i32_0 = arith.constant 0 : i32
    return %c0_i32, %arg0 : i32, i32
  }
}

</mosaic_0001>

<bundles_post_ra>
// kernel: tpu_custom_call.1
= control target key start
LH: loop header
LB: loop body
LE: loop exit
PB: predicated region body
PF: predicated region fallthrough
CT: control target
= control target key end

     0   :  { %vm47_vm0 = vcmask 56320   ;;  %v827_v6 = vmov 0   ;;  %s1282_s0 = inlined_call_operand.vmem [shape: f32[128,7], index: 0, kind: input, shape index: {}]   ;;  %s1283_s1 = inlined_call_operand.vmem [shape: s32[128,1], index: 1, kind: input, shape index: {}]   ;;  %s1284_s2 = inlined_call_operand.vmem [shape: f32[128,1], index: 2, kind: input, shape index: {}]   ;;  %s1285_s3 = inlined_call_operand.hbm [shape: f32[1,128], index: 3, kind: output, shape index: {}]  }
   0x1   :  { %v852_v0 = vld [vmem:[%s1282_s0 + $0x10] sm:$0xff]  ;;  %v857_v1 = vld [vmem:[%s1282_s0] sm:$0xff]  ;;  %v862_v2 = vld [vmem:[%s1282_s0 + $0x18] sm:$0xff]  ;;  %706 = vset.pattern.permute.xlu1 %v827_v6  ;;  %705 = vset.pattern.permute.xlu0 %v827_v6 }
   0x2   :  { %v54_v3 = vsel %vm47_vm0, %v852_v0, -inf  ;;  %v48_v4 = vsel %vm47_vm0, %v857_v1, -inf  ;;  %v871_v5 = vld [vmem:[%s1282_s0 + $0x8] sm:$0xff]  ;;  %v57_v7 = vsel %vm47_vm0, %v862_v2, -inf  ;;  %v885_v10 = vld [vmem:[%s1282_s0 + $0x20] sm:$0xff]  ;;  %v894_v13 = vld [vmem:[%s1282_s0 + $0x38] sm:$0xff] }
   0x3   :  { %55 = vmax.xlane.f32.xlu1 %v54_v3  ;;  %49 = vmax.xlane.f32.xlu0 %v48_v4  ;;  %v51_v8 = vsel %vm47_vm0, %v871_v5, -inf  ;;  %v880_v9 = vld [vmem:[%s1282_s0 + $0x28] sm:$0xff]  ;;  %v60_v12 = vsel %vm47_vm0, %v885_v10, -inf  ;;  %v899_v14 = vld [vmem:[%s1282_s0 + $0x30] sm:$0xff] }
   0x4   :  { %v63_v11 = vsel %vm47_vm0, %v880_v9, -inf }
   0x7   :  { %58 = vmax.xlane.f32.xlu1 %v57_v7  ;;  %52 = vmax.xlane.f32.xlu0 %v51_v8 }
   0xb   :  { %64 = vmax.xlane.f32.xlu1 %v63_v11  ;;  %61 = vmax.xlane.f32.xlu0 %v60_v12 }
   0xc   :  { %8 = vsyncpa [#allocation3], 0  ;;  %v69_v15 = vsel %vm47_vm0, %v894_v13, -inf  ;;  %v66_v16 = vsel %vm47_vm0, %v899_v14, -inf  ;;  %v908_v17 = vld [vmem:[%s1282_s0 + $0x48] sm:$0xff]  ;;  %v913_v18 = vld [vmem:[%s1282_s0 + $0x40] sm:$0xff]  ;;  %v224_v62 = vlaneseq }
   0xd   :  { %v75_v19 = vsel %vm47_vm0, %v908_v17, -inf  ;;  %v72_v20 = vsel %vm47_vm0, %v913_v18, -inf  ;;  %v922_v21 = vld [vmem:[%s1282_s0 + $0x58] sm:$0xff]  ;;  %v927_v22 = vld [vmem:[%s1282_s0 + $0x50] sm:$0xff]  ;;  %v936_v25 = vld [vmem:[%s1282_s0 + $0x68] sm:$0xff] }
   0xe   :  { %v81_v23 = vsel %vm47_vm0, %v922_v21, -inf  ;;  %v78_v24 = vsel %vm47_vm0, %v927_v22, -inf  ;;  %v941_v26 = vld [vmem:[%s1282_s0 + $0x60] sm:$0xff]  ;;  %v87_v27 = vsel %vm47_vm0, %v936_v25, -inf  ;;  %v950_v29 = vld [vmem:[%s1282_s0 + $0x78] sm:$0xff]  ;;  %v955_v30 = vld [vmem:[%s1282_s0 + $0x70] sm:$0xff] }
   0xf   :  { %70 = vmax.xlane.f32.xlu1 %v69_v15  ;;  %67 = vmax.xlane.f32.xlu0 %v66_v16  ;;  %v84_v28 = vsel %vm47_vm0, %v941_v26, -inf  ;;  %v93_v31 = vsel %vm47_vm0, %v950_v29, -inf  ;;  %v90_v32 = vsel %vm47_vm0, %v955_v30, -inf  ;;  %v32_v33 = vld [vmem:[%s1283_s1 + $0x8] sm:$0xff]  ;;  %v33_v34 = vld [vmem:[%s1283_s1 + $0x10] sm:$0xff]  ;;  %v31_v35 = vld [vmem:[%s1283_s1] sm:$0xff] }
  0x10   :  { %v34_v36 = vld [vmem:[%s1283_s1 + $0x18] sm:$0xff]  ;;  %v40_v37 = vld [vmem:[%s1283_s1 + $0x48] sm:$0xff]  ;;  %v35_v38 = vld [vmem:[%s1283_s1 + $0x20] sm:$0xff]  ;;  %v1021_v8 = vand.u32 127, %v224_v62 }
  0x11   :  { %v42_v39 = vld [vmem:[%s1283_s1 + $0x58] sm:$0xff]  ;;  %v36_v40 = vld [vmem:[%s1283_s1 + $0x28] sm:$0xff]  ;;  %v37_v42 = vld [vmem:[%s1283_s1 + $0x30] sm:$0xff] }
  0x12   :  { %v44_v41 = vld [vmem:[%s1283_s1 + $0x68] sm:$0xff]  ;;  %v46_v43 = vld [vmem:[%s1283_s1 + $0x78] sm:$0xff]  ;;  %v39_v45 = vld [vmem:[%s1283_s1 + $0x40] sm:$0xff] }
  0x13   :  { %76 = vmax.xlane.f32.xlu1 %v75_v19  ;;  %73 = vmax.xlane.f32.xlu0 %v72_v20  ;;  %v38_v44 = vld [vmem:[%s1283_s1 + $0x38] sm:$0xff]  ;;  %v41_v46 = vld [vmem:[%s1283_s1 + $0x50] sm:$0xff]  ;;  %v43_v47 = vld [vmem:[%s1283_s1 + $0x60] sm:$0xff] }
  0x14   :  { %v45_v48 = vld [vmem:[%s1283_s1 + $0x70] sm:$0xff] }
  0x17   :  { %82 = vmax.xlane.f32.xlu1 %v81_v23  ;;  %79 = vmax.xlane.f32.xlu0 %v78_v24 }
  0x1b   :  { %88 = vmax.xlane.f32.xlu1 %v87_v27  ;;  %85 = vmax.xlane.f32.xlu0 %v84_v28 }
  0x1f   :  { %94 = vmax.xlane.f32.xlu1 %v93_v31  ;;  %91 = vmax.xlane.f32.xlu0 %v90_v32 }
  0x30   :  { %230 = vperm.xlu1 %706, %v32_v33  }
  0x34   :  { %233 = vperm.xlu1 %706, %v33_v34  }
  0x35   :  { %227 = vperm.xlu0 %705, %v31_v35  }
  0x38   :  { %236 = vperm.xlu1 %706, %v34_v36  }
  0x39   :  { %254 = vperm.xlu0 %705, %v40_v37  }
  0x3c   :  { %239 = vperm.xlu1 %706, %v35_v38  }
  0x3d   :  { %260 = vperm.xlu0 %705, %v42_v39  }
  0x40   :  { %242 = vperm.xlu1 %706, %v36_v40  }
  0x41   :  { %266 = vperm.xlu0 %705, %v44_v41  }
  0x44   :  { %245 = vperm.xlu1 %706, %v37_v42  }
  0x45   :  { %272 = vperm.xlu0 %705, %v46_v43  }
  0x48   :  { %248 = vperm.xlu1 %706, %v38_v44  }
  0x4c   :  { %251 = vperm.xlu1 %706, %v39_v45  }
  0x50   :  { %257 = vperm.xlu1 %706, %v41_v46  }
  0x54   :  { %263 = vperm.xlu1 %706, %v43_v47  }
  0x58   :  { %269 = vperm.xlu1 %706, %v45_v48  }
  0x90   :  { %v56_v49 = vpop.xlane.xlu1 %55  ;;  %v50_v50 = vpop.xlane.xlu0 %49 }
  0x91   :  { %v96_v63 = vsub.f32 %v857_v1, %v50_v50  ;;  %v98_v12 = vsub.f32 %v852_v0, %v56_v49 }
  0x93   :  { %v112_v11 = vmul.f32 1.442695, %v96_v63  ;;  %v116_v23 = vmul.f32 1.442695, %v98_v12 }
  0x94   :  { %v59_v51 = vpop.xlane.xlu1 %58  ;;  %v53_v52 = vpop.xlane.xlu0 %52 }
  0x95   :  { %v99_v4 = vsub.f32 %v862_v2, %v59_v51  ;;  %v97_v7 = vsub.f32 %v871_v5, %v53_v52  ;;  %707 = vpow2.f32 %v112_v11 }
  0x97   :  { %v118_v15 = vmul.f32 1.442695, %v99_v4  ;;  %v114_v20 = vmul.f32 1.442695, %v97_v7 }
  0x98   :  { %v65_v53 = vpop.xlane.xlu1 %64  ;;  %v62_v54 = vpop.xlane.xlu0 %61 }
  0x99   :  { %v1028_v1 = vsub.f32 %v880_v9, %v65_v53  ;;  %709 = vpow2.f32 %v118_v15  ;;  %v100_v0 = vsub.f32 %v885_v10, %v62_v54 }
  0x9a   :  { %711 = vpow2.f32 %v114_v20 }
  0x9b   :  { %v122_v28 = vmul.f32 1.442695, %v1028_v1  ;;  %713 = vpow2.f32 %v116_v23  ;;  %v120_v10 = vmul.f32 1.442695, %v100_v0 }
  0x9c   :  { %v71_v55 = vpop.xlane.xlu1 %70  ;;  %v68_v56 = vpop.xlane.xlu0 %67 }
  0x9d   :  { %v1036_v9 = vsub.f32 %v894_v13, %v71_v55  ;;  %v1041_v36 = vsub.f32 %v899_v14, %v68_v56  ;;  %715 = vpow2.f32 %v122_v28 }
  0x9e   :  { %717 = vpow2.f32 %v120_v10 }
  0x9f   :  { %v126_v13 = vmul.f32 1.442695, %v1036_v9  ;;  %v708_v40 = vpop.eup %707  ;;  %v124_v42 = vmul.f32 1.442695, %v1041_v36 }
  0xa0   :  { %v77_v57 = vpop.xlane.xlu1 %76  ;;  %v74_v58 = vpop.xlane.xlu0 %73  ;;  %v144_v48 = vsel %vm47_vm0, %v708_v40, 0.0 }
  0xa1   :  { %v1046_v37 = vsub.f32 %v908_v17, %v77_v57  ;;  %v1051_v14 = vsub.f32 %v913_v18, %v74_v58  ;;  %719 = vpow2.f32 %v126_v13 }
  0xa2   :  { %721 = vpow2.f32 %v124_v42 }
  0xa3   :  { %v710_v43 = vpop.eup %709  ;;  %v130_v44 = vmul.f32 1.442695, %v1046_v37  ;;  %v128_v18 = vmul.f32 1.442695, %v1051_v14 }
  0xa4   :  { %v83_v59 = vpop.xlane.xlu1 %82  ;;  %v1009_v60 = vpop.xlane.xlu0 %79  ;;  %v153_v53 = vsel %vm47_vm0, %v710_v43, 0.0 }
  0xa5   :  { %v1056_v17 = vsub.f32 %v922_v21, %v83_v59  ;;  %v712_v46 = vpop.eup %711  ;;  %v1063_v49 = vsub.f32 %v927_v22, %v1009_v60  ;;  %723 = vpow2.f32 %v130_v44 }
  0xa6   :  { %v714_v51 = vpop.eup %713  ;;  %v147_v52 = vsel %vm47_vm0, %v712_v46, 0.0  ;;  %725 = vpow2.f32 %v128_v18 }
  0xa7   :  { %v134_v50 = vmul.f32 1.442695, %v1056_v17  ;;  %v716_v54 = vpop.eup %715  ;;  %v132_v55 = vmul.f32 1.442695, %v1063_v49  ;;  %v150_v59 = vsel %vm47_vm0, %v714_v51, 0.0 }
  0xa8   :  { %v1011_v61 = vpop.xlane.xlu1 %88  ;;  %v1014_v3 = vpop.xlane.xlu0 %85  ;;  %v159_v60 = vsel %vm47_vm0, %v716_v54, 0.0 }
  0xa9   :  { %v1068_v21 = vsub.f32 %v936_v25, %v1011_v61  ;;  %v1075_v22 = vsub.f32 %v941_v26, %v1014_v3  ;;  %727 = vpow2.f32 %v134_v50  ;;  %v718_v58 = vpop.eup %717 }
  0xaa   :  { %729 = vpow2.f32 %v132_v55 }
  0xab   :  { %v138_v56 = vmul.f32 1.442695, %v1068_v21  ;;  %v720_v61 = vpop.eup %719  ;;  %v136_v26 = vmul.f32 1.442695, %v1075_v22 }
  0xac   :  { %v1017_v6 = vpop.xlane.xlu1 %94  ;;  %v1024_v16 = vpop.xlane.xlu0 %91 }
  0xad   :  { %v1080_v25 = vsub.f32 %v950_v29, %v1017_v6  ;;  %731 = vpow2.f32 %v138_v56  ;;  %v1088_v3 = vsub.f32 %v955_v30, %v1024_v16  ;;  %v722_v29 = vpop.eup %721  ;;  %v165_v6 = vsel %vm47_vm0, %v720_v61, 0.0 }
  0xae   :  { %733 = vpow2.f32 %v136_v26 }
  0xb0   :  { %v231_v19 = vpop.permute.xlu1 %230 }
  0xb1   :  { %vm275_vm1 = vcmp.eq.s32.totalorder %v1021_v8, %v231_v19  ;;  %v162_v19 = vsel %vm47_vm0, %v722_v29, 0.0 }
  0xb2   :  { %v291_v2 = vsel %vm275_vm1, %v97_v7, 0.0  ;;  %v724_v7 = vpop.eup %723 }
  0xb3   :  { %v309_v5 = vsel %vm47_vm0, %v291_v2, 0.0  ;;  %v726_v15 = vpop.eup %725  ;;  %v171_v20 = vsel %vm47_vm0, %v724_v7, 0.0 }
  0xb4   :  { %v234_v24 = vpop.permute.xlu1 %233  ;;  %310 = vadd.xlane.f32.xlu0 %v309_v5  ;;  %v228_v27 = vpop.permute.xlu0 %227  ;;  %v168_v5 = vsel %vm47_vm0, %v726_v15, 0.0 }
  0xb5   :  { %vm276_vm2 = vcmp.eq.s32.totalorder %v1021_v8, %v234_v24  ;;  %vm274_vm3 = vcmp.eq.s32.totalorder %v1021_v8, %v228_v27  ;;  %v728_v30 = vpop.eup %727 }
  0xb6   :  { %v292_v31 = vsel %vm276_vm2, %v98_v12, 0.0  ;;  %v290_v32 = vsel %vm274_vm3, %v96_v63, 0.0  ;;  %v142_v63 = vmul.f32 1.442695, %v1080_v25  ;;  %v140_v12 = vmul.f32 1.442695, %v1088_v3  ;;  %v730_v2 = vpop.eup %729 }
  0xb7   :  { %v312_v33 = vsel %vm47_vm0, %v292_v31, 0.0  ;;  %v306_v34 = vsel %vm47_vm0, %v290_v32, 0.0  ;;  %v177_v23 = vsel %vm47_vm0, %v728_v30, 0.0  ;;  %v732_v24 = vpop.eup %731  ;;  %vm594_vm2 = vcmask 195712  }
  0xb8   :  { %v237_v35 = vpop.permute.xlu1 %236  ;;  %313 = vadd.xlane.f32.xlu0 %v312_v33  ;;  %307 = vadd.xlane.f32.xlu1 %v306_v34  ;;  %735 = vpow2.f32 %v142_v63  ;;  %v734_v27 = vpop.eup %733  ;;  %v183_v28 = vsel %vm47_vm0, %v732_v24, 0.0  ;;  %vm601_vm3 = vcmask 261312  }
  0xb9   :  { %vm277_vm4 = vcmp.eq.s32.totalorder %v1021_v8, %v237_v35  ;;  %737 = vpow2.f32 %v140_v12  ;;  %v255_v32 = vpop.permute.xlu0 %254  ;;  %v180_v34 = vsel %vm47_vm0, %v734_v27, 0.0 }
  0xba   :  { %v293_v38 = vsel %vm277_vm4, %v99_v4, 0.0  ;;  %v156_v4 = vsel %vm47_vm0, %v718_v58, 0.0  ;;  %vm283_vm9 = vcmp.eq.s32.totalorder %v1021_v8, %v255_v32  ;;  %vm608_vm4 = vcmask 326912  }
  0xbb   :  { %v315_v39 = vsel %vm47_vm0, %v293_v38, 0.0 }
  0xbc   :  { %v240_v41 = vpop.permute.xlu1 %239  ;;  %316 = vadd.xlane.f32.xlu1 %v315_v39 }
  0xbd   :  { %vm278_vm5 = vcmp.eq.s32.totalorder %v1021_v8, %v240_v41  ;;  %v261_v38 = vpop.permute.xlu0 %260 }
  0xbe   :  { %v294_v45 = vsel %vm278_vm5, %v100_v0, 0.0  ;;  %v174_v0 = vsel %vm47_vm0, %v730_v2, 0.0  ;;  %vm285_vm11 = vcmp.eq.s32.totalorder %v1021_v8, %v261_v38  ;;  %vm615_vm5 = vcmask 392512  }
  0xbf   :  { %v318_v47 = vsel %vm47_vm0, %v294_v45, 0.0  ;;  %v301_v50 = vsel %vm285_vm11, %v1056_v17, 0.0  ;;  %vm657_vm11 = vcmask 786112  }
  0xc0   :  { %319 = vadd.xlane.f32.xlu0 %v318_v47  ;;  %145 = vadd.xlane.f32.xlu1 %v144_v48  ;;  %v243_v57 = vpop.permute.xlu1 %242  ;;  %v299_v48 = vsel %vm283_vm9, %v1046_v37, 0.0  ;;  %vm643_vm9 = vcmask 654912  }
  0xc1   :  { %vm279_vm6 = vcmp.eq.s32.totalorder %v1021_v8, %v243_v57  ;;  %v267_v45 = vpop.permute.xlu0 %266 }
  0xc2   :  { %v736_v31 = vpop.eup %735  ;;  %v295_v13 = vsel %vm279_vm6, %v1028_v1, 0.0  ;;  %vm287_vm13 = vcmp.eq.s32.totalorder %v1021_v8, %v267_v45  ;;  %vm622_vm6 = vcmask 458112  }
  0xc3   :  { %v189_v35 = vsel %vm47_vm0, %v736_v31, 0.0  ;;  %v738_v10 = vpop.eup %737  ;;  %v321_v41 = vsel %vm47_vm0, %v295_v13, 0.0  ;;  %v303_v54 = vsel %vm287_vm13, %v1068_v21, 0.0  ;;  %vm671_vm13 = vcmask 917312  }
  0xc4   :  { %148 = vadd.xlane.f32.xlu0 %v147_v52  ;;  %154 = vadd.xlane.f32.xlu1 %v153_v53  ;;  %v246_v11 = vpop.permute.xlu1 %245  ;;  %v186_v40 = vsel %vm47_vm0, %v738_v10, 0.0  ;;  %v339_v52 = vsel %vm47_vm0, %v301_v50, 0.0  ;;  %v405_v50 = vld [vmem:[%s1284_s2 + $0x18] sm:$0xff] }
  0xc5   :  { %vm280_vm7 = vcmp.eq.s32.totalorder %v1021_v8, %v246_v11 }
  0xc6   :  { %v296_v42 = vsel %vm280_vm7, %v1041_v36, 0.0  ;;  %v333_v36 = vsel %vm47_vm0, %v299_v48, 0.0  ;;  %vm629_vm7 = vcmask 523712  }
  0xc7   :  { %v324_v1 = vsel %vm47_vm0, %v296_v42, 0.0 }
  0xc8   :  { %151 = vadd.xlane.f32.xlu0 %v150_v59  ;;  %160 = vadd.xlane.f32.xlu1 %v159_v60  ;;  %v249_v16 = vpop.permute.xlu1 %248 }
  0xc9   :  { %vm281_vm8 = vcmp.eq.s32.totalorder %v1021_v8, %v249_v16 }
  0xca   :  { %v297_v43 = vsel %vm281_vm8, %v1036_v9, 0.0  ;;  %vm636_vm8 = vcmask 589312  }
  0xcb   :  { %v327_v44 = vsel %vm47_vm0, %v297_v43, 0.0 }
  0xcc   :  { %157 = vadd.xlane.f32.xlu0 %v156_v4  ;;  %166 = vadd.xlane.f32.xlu1 %v165_v6  ;;  %v252_v33 = vpop.permute.xlu1 %251 }
  0xcd   :  { %vm282_vm10 = vcmp.eq.s32.totalorder %v1021_v8, %v252_v33 }
  0xce   :  { %v298_v47 = vsel %vm282_vm10, %v1051_v14, 0.0  ;;  %v273_v14 = vpop.permute.xlu0 %272  ;;  %vm650_vm10 = vcmask 720512  }
  0xcf   :  { %v330_v9 = vsel %vm47_vm0, %v298_v47, 0.0  ;;  %vm289_vm15 = vcmp.eq.s32.totalorder %v1021_v8, %v273_v14  ;;  %v403_v14 = vld [vmem:[%s1284_s2 + $0x8] sm:$0xff] }
  0xd0   :  { %163 = vadd.xlane.f32.xlu0 %v162_v19  ;;  %172 = vadd.xlane.f32.xlu1 %v171_v20  ;;  %v258_v39 = vpop.permute.xlu1 %257  ;;  %v305_v56 = vsel %vm289_vm15, %v1080_v25, 0.0  ;;  %vm685_vm15 = vcmask 1048512  }
  0xd1   :  { %vm284_vm12 = vcmp.eq.s32.totalorder %v1021_v8, %v258_v39 }
  0xd2   :  { %v300_v18 = vsel %vm284_vm12, %v1063_v49, 0.0  ;;  %v345_v49 = vsel %vm47_vm0, %v303_v54, 0.0  ;;  %vm664_vm12 = vcmask 851712  }
  0xd3   :  { %v336_v51 = vsel %vm47_vm0, %v300_v18, 0.0 }
  0xd4   :  { %169 = vadd.xlane.f32.xlu0 %v168_v5  ;;  %178 = vadd.xlane.f32.xlu1 %v177_v23  ;;  %v264_v46 = vpop.permute.xlu1 %263 }
  0xd5   :  { %vm286_vm14 = vcmp.eq.s32.totalorder %v1021_v8, %v264_v46  ;;  %v402_v46 = vld [vmem:[%s1284_s2] sm:$0xff] }
  0xd6   :  { %v302_v53 = vsel %vm286_vm14, %v1075_v22, 0.0  ;;  %v351_v22 = vsel %vm47_vm0, %v305_v56, 0.0  ;;  %vm678_vm14 = vcmask 982912  }
  0xd7   :  { %v342_v17 = vsel %vm47_vm0, %v302_v53, 0.0 }
  0xd8   :  { %175 = vadd.xlane.f32.xlu0 %v174_v0  ;;  %184 = vadd.xlane.f32.xlu1 %v183_v28  ;;  %v270_v37 = vpop.permute.xlu1 %269 }
  0xd9   :  { %vm288_vm1 = vcmp.eq.s32.totalorder %v1021_v8, %v270_v37 }
  0xda   :  { %v304_v55 = vsel %vm288_vm1, %v1088_v3, 0.0 }
  0xdb   :  { %v348_v57 = vsel %vm47_vm0, %v304_v55, 0.0  ;;  %vm587_vm0 = vcmask 130112  }
  0xdc   :  { %181 = vadd.xlane.f32.xlu0 %v180_v34  ;;  %190 = vadd.xlane.f32.xlu1 %v189_v35 }
  0xe0   :  { %187 = vadd.xlane.f32.xlu0 %v186_v40  ;;  %322 = vadd.xlane.f32.xlu1 %v321_v41 }
  0xe4   :  { %325 = vadd.xlane.f32.xlu0 %v324_v1  ;;  %328 = vadd.xlane.f32.xlu1 %v327_v44 }
  0xe8   :  { %331 = vadd.xlane.f32.xlu0 %v330_v9  ;;  %334 = vadd.xlane.f32.xlu1 %v333_v36 }
  0xec   :  { %337 = vadd.xlane.f32.xlu0 %v336_v51  ;;  %340 = vadd.xlane.f32.xlu1 %v339_v52 }
  0xf0   :  { %343 = vadd.xlane.f32.xlu0 %v342_v17  ;;  %346 = vadd.xlane.f32.xlu1 %v345_v49 }
  0xf4   :  { %349 = vadd.xlane.f32.xlu0 %v348_v57  ;;  %352 = vadd.xlane.f32.xlu1 %v351_v22 }
 0x141   :  { %v311_v21 = vpop.xlane.xlu0 %310 }
 0x145   :  { %v308_v58 = vpop.xlane.xlu1 %307  ;;  %v314_v59 = vpop.xlane.xlu0 %313 }
 0x149   :  { %v317_v60 = vpop.xlane.xlu1 %316 }
 0x14d   :  { %v146_v61 = vpop.xlane.xlu1 %145  ;;  %v320_v26 = vpop.xlane.xlu0 %319 }
 0x14e   :  { %739 = vlog2.f32 %v146_v61 }
 0x151   :  { %v155_v63 = vpop.xlane.xlu1 %154  ;;  %v149_v29 = vpop.xlane.xlu0 %148 }
 0x152   :  { %741 = vlog2.f32 %v155_v63 }
 0x153   :  { %743 = vlog2.f32 %v149_v29 }
 0x155   :  { %v161_v3 = vpop.xlane.xlu1 %160  ;;  %v152_v4 = vpop.xlane.xlu0 %151 }
 0x156   :  { %745 = vlog2.f32 %v152_v4 }
 0x158   :  { %v740_v25 = vpop.eup %739 }
 0x159   :  { %v193_v6 = vmul.f32 0.6931472, %v740_v25  ;;  %v167_v7 = vpop.xlane.xlu1 %166  ;;  %v158_v11 = vpop.xlane.xlu0 %157 }
 0x15a   :  { %747 = vlog2.f32 %v158_v11 }
 0x15b   :  { %v354_v12 = vsub.f32 %v308_v58, %v193_v6  ;;  %749 = vlog2.f32 %v161_v3 }
 0x15c   :  { %v742_v15 = vpop.eup %741 }
 0x15d   :  { %v744_v19 = vpop.eup %743  ;;  %v370_v20 = vmul.f32 1.442695, %v354_v12  ;;  %v199_v30 = vmul.f32 0.6931472, %v742_v15  ;;  %v173_v16 = vpop.xlane.xlu1 %172  ;;  %v418_v53 = vmul.f32 %v402_v46, %v354_v12  ;;  %v404_v12 = vld [vmem:[%s1284_s2 + $0x10] sm:$0xff] }
 0x15e   :  { %v164_v2 = vpop.xlane.xlu0 %163  ;;  %v195_v5 = vmul.f32 0.6931472, %v744_v19 }
 0x15f   :  { %751 = vpow2.f32 %v370_v20  ;;  %v357_v23 = vsub.f32 %v317_v60, %v199_v30 }
 0x160   :  { %v355_v24 = vsub.f32 %v311_v21, %v195_v5  ;;  %753 = vlog2.f32 %v167_v7  ;;  %v746_v27 = vpop.eup %745 }
 0x161   :  { %v376_v0 = vmul.f32 1.442695, %v357_v23  ;;  %755 = vlog2.f32 %v173_v16  ;;  %v179_v28 = vpop.xlane.xlu1 %178  ;;  %v197_v33 = vmul.f32 0.6931472, %v746_v27  ;;  %v421_v56 = vmul.f32 %v405_v50, %v357_v23 }
 0x162   :  { %v170_v31 = vpop.xlane.xlu0 %169  ;;  %v372_v32 = vmul.f32 1.442695, %v355_v24  ;;  %757 = vlog2.f32 %v164_v2  ;;  %v419_v57 = vmul.f32 %v403_v14, %v355_v24 }
 0x163   :  { %759 = vpow2.f32 %v376_v0  ;;  %v1135_v34 = vsub.f32 %v314_v59, %v197_v33 }
 0x164   :  { %761 = vpow2.f32 %v372_v32  ;;  %v748_v35 = vpop.eup %747 }
 0x165   :  { %v185_v10 = vpop.xlane.xlu1 %184  ;;  %v374_v38 = vmul.f32 1.442695, %v1135_v34  ;;  %v201_v39 = vmul.f32 0.6931472, %v748_v35  ;;  %763 = vlog2.f32 %v170_v31  ;;  %v750_v40 = vpop.eup %749  ;;  %v420_v31 = vmul.f32 %v404_v12, %v1135_v34 }
 0x166   :  { %v176_v13 = vpop.xlane.xlu0 %175  ;;  %v203_v36 = vmul.f32 0.6931472, %v750_v40 }
 0x167   :  { %765 = vpow2.f32 %v374_v38  ;;  %v1138_v41 = vsub.f32 %v320_v26, %v201_v39 }
 0x168   :  { %767 = vlog2.f32 %v179_v28 }
 0x169   :  { %v752_v42 = vpop.eup %751  ;;  %v191_v43 = vpop.xlane.xlu1 %190  ;;  %v378_v45 = vmul.f32 1.442695, %v1138_v41  ;;  %769 = vlog2.f32 %v176_v13 }
 0x16a   :  { %v182_v1 = vpop.xlane.xlu0 %181  ;;  %v754_v44 = vpop.eup %753  ;;  %v434_v47 = vsub.f32 1.0, %v752_v42 }
 0x16b   :  { %v756_v48 = vpop.eup %755  ;;  %771 = vpow2.f32 %v378_v45  ;;  %v207_v58 = vmul.f32 0.6931472, %v754_v44 }
 0x16c   :  { %v758_v9 = vpop.eup %757  ;;  %v450_v18 = vmax.f32 %v434_v47, 0.0  ;;  %773 = vlog2.f32 %v185_v10  ;;  %v211_v29 = vmul.f32 0.6931472, %v756_v48 }
 0x16d   :  { %v760_v37 = vpop.eup %759  ;;  %v323_v51 = vpop.xlane.xlu1 %322  ;;  %775 = vlog2.f32 %v182_v1  ;;  %v205_v59 = vmul.f32 0.6931472, %v758_v9 }
 0x16e   :  { %v188_v52 = vpop.xlane.xlu0 %187  ;;  %v762_v54 = vpop.eup %761  ;;  %v1150_v17 = vsub.f32 %v323_v51, %v203_v36  ;;  %v466_v49 = vmul.f32 %v450_v18, %v450_v18  ;;  %v437_v55 = vsub.f32 1.0, %v760_v37  ;;  %777 = vlog2.f32 %v191_v43  ;;  %v406_v18 = vld [vmem:[%s1284_s2 + $0x20] sm:$0xff] }
 0x16f   :  { %v435_v22 = vsub.f32 1.0, %v762_v54  ;;  %v764_v61 = vpop.eup %763 }
 0x170   :  { %v380_v21 = vmul.f32 1.442695, %v1150_v17  ;;  %v482_v60 = vmul.f32 %v466_v49, %v418_v53  ;;  %v453_v3 = vmax.f32 %v437_v55, 0.0  ;;  %v209_v5 = vmul.f32 0.6931472, %v764_v61 }
 0x171   :  { %v329_v26 = vpop.xlane.xlu1 %328  ;;  %v451_v4 = vmax.f32 %v435_v22, 0.0  ;;  %v766_v25 = vpop.eup %765 }
 0x172   :  { %v326_v63 = vpop.xlane.xlu0 %325  ;;  %779 = vpow2.f32 %v380_v21  ;;  %v1153_v6 = vsub.f32 %v329_v26, %v207_v58  ;;  %v498_v11 = vsub.f32 0.0, %v482_v60  ;;  %v768_v15 = vpop.eup %767  ;;  %v469_v19 = vmul.f32 %v453_v3, %v453_v3 }
 0x173   :  { %v1155_v7 = vsub.f32 %v326_v63, %v205_v59  ;;  %781 = vlog2.f32 %v188_v52  ;;  %v467_v20 = vmul.f32 %v451_v4, %v451_v4  ;;  %v436_v30 = vsub.f32 1.0, %v766_v25  ;;  %v770_v23 = vpop.eup %769  ;;  %v407_v59 = vld [vmem:[%s1284_s2 + $0x28] sm:$0xff] }
 0x174   :  { %v384_v16 = vmul.f32 1.442695, %v1153_v6  ;;  %531 = vperm.xlu0 %705, %v498_v11   ;;  %v485_v0 = vmul.f32 %v469_v19, %v421_v56  ;;  %v215_v13 = vmul.f32 0.6931472, %v768_v15  ;;  %v213_v44 = vmul.f32 0.6931472, %v770_v23 }
 0x175   :  { %v382_v2 = vmul.f32 1.442695, %v1155_v7  ;;  %v335_v24 = vpop.xlane.xlu1 %334  ;;  %v483_v28 = vmul.f32 %v467_v20, %v419_v57  ;;  %v452_v32 = vmax.f32 %v436_v30, 0.0  ;;  %v772_v33 = vpop.eup %771  ;;  %v422_v21 = vmul.f32 %v406_v18, %v1138_v41 }
 0x176   :  { %v332_v27 = vpop.xlane.xlu0 %331  ;;  %783 = vpow2.f32 %v384_v16  ;;  %v1163_v35 = vsub.f32 %v335_v24, %v211_v29  ;;  %v501_v38 = vsub.f32 0.0, %v485_v0  ;;  %v774_v42 = vpop.eup %773  ;;  %v438_v48 = vsub.f32 1.0, %v772_v33 }
 0x177   :  { %v1165_v10 = vsub.f32 %v332_v27, %v209_v5  ;;  %785 = vpow2.f32 %v382_v2  ;;  %v499_v39 = vsub.f32 0.0, %v483_v28  ;;  %v468_v40 = vmul.f32 %v452_v32, %v452_v32  ;;  %v776_v45 = vpop.eup %775  ;;  %v409_v2 = vld [vmem:[%s1284_s2 + $0x38] sm:$0xff] }
 0x178   :  { %v388_v43 = vmul.f32 1.442695, %v1163_v35  ;;  %540 = vperm.xlu0 %705, %v501_v38   ;;  %v778_v50 = vpop.eup %777  ;;  %v219_v37 = vmul.f32 0.6931472, %v774_v42  ;;  %v454_v51 = vmax.f32 %v438_v48, 0.0  ;;  %v423_v12 = vmul.f32 %v407_v59, %v1150_v17  ;;  %v408_v17 = vld [vmem:[%s1284_s2 + $0x30] sm:$0xff] }
 0x179   :  { %v386_v1 = vmul.f32 1.442695, %v1165_v10  ;;  %534 = vperm.xlu1 %706, %v499_v39   ;;  %v341_v34 = vpop.xlane.xlu1 %340  ;;  %v484_v47 = vmul.f32 %v468_v40, %v420_v31  ;;  %v217_v49 = vmul.f32 0.6931472, %v776_v45  ;;  %v223_v29 = vmul.f32 0.6931472, %v778_v50 }
 0x17a   :  { %v338_v46 = vpop.xlane.xlu0 %337  ;;  %787 = vpow2.f32 %v388_v43  ;;  %v1169_v9 = vsub.f32 %v341_v34, %v215_v13  ;;  %v470_v58 = vmul.f32 %v454_v51, %v454_v51  ;;  %v425_v38 = vmul.f32 %v409_v2, %v1153_v6 }
 0x17b   :  { %v1171_v36 = vsub.f32 %v338_v46, %v213_v44  ;;  %789 = vpow2.f32 %v386_v1  ;;  %v500_v14 = vsub.f32 0.0, %v484_v47  ;;  %v424_v43 = vmul.f32 %v408_v17, %v1155_v7  ;;  %v411_v1 = vld [vmem:[%s1284_s2 + $0x48] sm:$0xff]  ;;  %v410_v46 = vld [vmem:[%s1284_s2 + $0x40] sm:$0xff] }
 0x17c   :  { %v780_v52 = vpop.eup %779  ;;  %v392_v53 = vmul.f32 1.442695, %v1169_v9  ;;  %v486_v63 = vmul.f32 %v470_v58, %v422_v21  ;;  %v427_v7 = vmul.f32 %v411_v1, %v1163_v35 }
 0x17d   :  { %v390_v54 = vmul.f32 1.442695, %v1171_v36  ;;  %v782_v55 = vpop.eup %781  ;;  %v439_v56 = vsub.f32 1.0, %v780_v52  ;;  %537 = vperm.xlu1 %706, %v500_v14   ;;  %v347_v57 = vpop.xlane.xlu1 %346  ;;  %v426_v52 = vmul.f32 %v410_v46, %v1165_v10 }
 0x17e   :  { %v344_v22 = vpop.xlane.xlu0 %343  ;;  %791 = vpow2.f32 %v392_v53  ;;  %v1182_v60 = vsub.f32 %v347_v57, %v219_v37  ;;  %v221_v41 = vmul.f32 0.6931472, %v782_v55  ;;  %v502_v19 = vsub.f32 0.0, %v486_v63  ;;  %v413_v53 = vld [vmem:[%s1284_s2 + $0x58] sm:$0xff]  ;;  %v412_v57 = vld [vmem:[%s1284_s2 + $0x50] sm:$0xff] }
 0x17f   :  { %v1184_v61 = vsub.f32 %v344_v22, %v217_v49  ;;  %v455_v26 = vmax.f32 %v439_v56, 0.0  ;;  %793 = vpow2.f32 %v390_v54  ;;  %v429_v10 = vmul.f32 %v413_v53, %v1169_v9 }
 0x180   :  { %v784_v3 = vpop.eup %783  ;;  %v396_v4 = vmul.f32 1.442695, %v1182_v60  ;;  %v610_v53 = vadd.s32 4294967256, %v1021_v8 }
 0x181   :  { %v394_v25 = vmul.f32 1.442695, %v1184_v61  ;;  %v786_v11 = vpop.eup %785  ;;  %v441_v15 = vsub.f32 1.0, %v784_v3  ;;  %v353_v20 = vpop.xlane.xlu1 %352  ;;  %v471_v16 = vmul.f32 %v455_v26, %v455_v26  ;;  %543 = vperm.xlu1 %706, %v502_v19   ;;  %v428_v3 = vmul.f32 %v412_v57, %v1171_v36 }
 0x182   :  { %v350_v30 = vpop.xlane.xlu0 %349  ;;  %v440_v5 = vsub.f32 1.0, %v786_v11  ;;  %795 = vpow2.f32 %v396_v4  ;;  %v1192_v23 = vsub.f32 %v353_v20, %v223_v29  ;;  %v415_v4 = vld [vmem:[%s1284_s2 + $0x68] sm:$0xff] }
 0x183   :  { %v1194_v24 = vsub.f32 %v350_v30, %v221_v41  ;;  %v457_v27 = vmax.f32 %v441_v15, 0.0  ;;  %797 = vpow2.f32 %v394_v25  ;;  %v487_v0 = vmul.f32 %v471_v16, %v423_v12  ;;  %v414_v15 = vld [vmem:[%s1284_s2 + $0x60] sm:$0xff] }
 0x184   :  { %v788_v28 = vpop.eup %787  ;;  %v456_v31 = vmax.f32 %v440_v5, 0.0  ;;  %v400_v32 = vmul.f32 1.442695, %v1192_v23  ;;  %v431_v36 = vmul.f32 %v415_v4, %v1182_v60  ;;  %v430_v17 = vmul.f32 %v414_v15, %v1184_v61 }
 0x185   :  { %v398_v33 = vmul.f32 1.442695, %v1194_v24  ;;  %v790_v13 = vpop.eup %789  ;;  %v443_v39 = vsub.f32 1.0, %v788_v28  ;;  %v503_v40 = vsub.f32 0.0, %v487_v0  ;;  %v473_v42 = vmul.f32 %v457_v27, %v457_v27  ;;  %v417_v0 = vld [vmem:[%s1284_s2 + $0x78] sm:$0xff] }
 0x186   :  { %v442_v44 = vsub.f32 1.0, %v790_v13  ;;  %799 = vpow2.f32 %v400_v32  ;;  %v472_v45 = vmul.f32 %v456_v31, %v456_v31  ;;  %v416_v13 = vld [vmem:[%s1284_s2 + $0x70] sm:$0xff]  ;;  %s828_s2 = smov [#allocation2]  }
 0x187   :  { %v459_v34 = vmax.f32 %v443_v39, 0.0  ;;  %801 = vpow2.f32 %v398_v33  ;;  %546 = vperm.xlu0 %705, %v503_v40   ;;  %v489_v6 = vmul.f32 %v473_v42, %v425_v38  ;;  %v433_v40 = vmul.f32 %v417_v0, %v1192_v23  ;;  %s695_s22 = sshll.u32 %s828_s2, 4  ;;  %s696_s22 = int_to_ptr.vmem [resolvable:$true] %s695_s22 }
 0x188   :  { %v792_v47 = vpop.eup %791  ;;  %v458_v48 = vmax.f32 %v442_v44, 0.0  ;;  %v488_v18 = vmul.f32 %v472_v45, %v424_v43  ;;  %v432_v43 = vmul.f32 %v416_v13, %v1194_v24  ;;  %v589_v23 = vadd.s32 4294967280, %v1021_v8  ;;  %s803_s23 = scalar_lea.vmem %s696_s22, 16  ;;  %s807_s24 = scalar_lea.vmem %s696_s22, 32 }
 0x189   :  { %v794_v50 = vpop.eup %793  ;;  %v445_v14 = vsub.f32 1.0, %v792_v47  ;;  %v505_v37 = vsub.f32 0.0, %v489_v6  ;;  %v475_v51 = vmul.f32 %v459_v34, %v459_v34  ;;  %p804_p0 = scmp.ne.s32.totalorder %s696_s22, %s803_s23  ;;  %p808_p1 = scmp.lt.s32.totalorder %s696_s22, %s696_s22 }
 0x18a   :  { %v444_v54 = vsub.f32 1.0, %v794_v50  ;;  %v504_v49 = vsub.f32 0.0, %v488_v18  ;;  %v474_v55 = vmul.f32 %v458_v48, %v458_v48  ;;  %v582_v48 = vadd.s32 4294967288, %v1021_v8  ;;  %p809_p2 = scmp.lt.s32.totalorder %s807_s24, %s803_s23 }
 0x18b   :  { %v461_v56 = vmax.f32 %v445_v14, 0.0  ;;  %552 = vperm.xlu0 %705, %v505_v37   ;;  %v491_v22 = vmul.f32 %v475_v51, %v427_v7  ;;  %v1238_v50 = vshrl.u32 %v224_v62, 7  ;;  %v603_v37 = vadd.s32 4294967264, %v1021_v8 }
 0x18c   :  { %v796_v35 = vpop.eup %795  ;;  %v460_v21 = vmax.f32 %v444_v54, 0.0  ;;  %549 = vperm.xlu1 %706, %v504_v49   ;;  %v490_v58 = vmul.f32 %v474_v55, %v426_v52  ;;  %v596_v52 = vadd.s32 4294967272, %v1021_v8  ;;  %p810_p3 = por %p809_p2, %p808_p1 }
 0x18d   :  { %v798_v59 = vpop.eup %797  ;;  %v447_v26 = vsub.f32 1.0, %v796_v35  ;;  %v507_v63 = vsub.f32 0.0, %v491_v22  ;;  %v477_v29 = vmul.f32 %v461_v56, %v461_v56  ;;  %v585_v24 = vsub.s32 %v582_v48, %v1238_v50 }
 0x18e   :  { %v446_v25 = vsub.f32 1.0, %v798_v59  ;;  %v506_v41 = vsub.f32 0.0, %v490_v58  ;;  %v476_v11 = vmul.f32 %v460_v21, %v460_v21  ;;  %v592_v14 = vsub.s32 %v589_v23, %v1238_v50  ;;  %p811_p4 = pnand %p810_p3, %p804_p0 }
 0x18f   :  { %v463_v12 = vmax.f32 %v447_v26, 0.0  ;;  %558 = vperm.xlu0 %705, %v507_v63   ;;  %v493_v19 = vmul.f32 %v477_v29, %v429_v10  ;;  %v580_v51 = vsub.s32 %v1021_v8, %v1238_v50  ;;  %v606_v55 = vsub.s32 %v603_v37, %v1238_v50 }
 0x190   :  { %v800_v9 = vpop.eup %799  ;;  %v462_v20 = vmax.f32 %v446_v25, 0.0  ;;  %555 = vperm.xlu1 %706, %v506_v41   ;;  %v492_v30 = vmul.f32 %v476_v11, %v428_v3  ;;  %v617_v56 = vadd.s32 4294967248, %v1021_v8  ;;  %v599_v22 = vsub.s32 %v596_v52, %v1238_v50 }
 0x191   :  { %v802_v16 = vpop.eup %801  ;;  %v449_v2 = vsub.f32 1.0, %v800_v9  ;;  %v509_v5 = vsub.f32 0.0, %v493_v19  ;;  %v479_v27 = vmul.f32 %v463_v12, %v463_v12  ;;  %v613_v21 = vsub.s32 %v610_v53, %v1238_v50 }
 0x192   :  { %v448_v28 = vsub.f32 1.0, %v802_v16  ;;  %v508_v31 = vsub.f32 0.0, %v492_v30  ;;  %v478_v32 = vmul.f32 %v462_v20, %v462_v20  ;;  %v624_v58 = vadd.s32 4294967240, %v1021_v8 }
 0x193   :  { %v465_v33 = vmax.f32 %v449_v2, 0.0  ;;  %564 = vperm.xlu0 %705, %v509_v5   ;;  %v495_v38 = vmul.f32 %v479_v27, %v431_v36  ;;  %v620_v29 = vsub.s32 %v617_v56, %v1238_v50  ;;  %v631_v3 = vadd.s32 4294967232, %v1021_v8 }
 0x194   :  { %v464_v60 = vmax.f32 %v448_v28, 0.0  ;;  %561 = vperm.xlu1 %706, %v508_v31   ;;  %v494_v39 = vmul.f32 %v478_v32, %v430_v17  ;;  %v627_v41 = vsub.s32 %v624_v58, %v1238_v50  ;;  %v638_v11 = vadd.s32 4294967224, %v1021_v8 }
 0x195   :  { %v511_v61 = vsub.f32 0.0, %v495_v38  ;;  %v481_v42 = vmul.f32 %v465_v33, %v465_v33  ;;  %v634_v30 = vsub.s32 %v631_v3, %v1238_v50  ;;  %v645_v16 = vadd.s32 4294967216, %v1021_v8 }
 0x196   :  { %v510_v1 = vsub.f32 0.0, %v494_v39  ;;  %v480_v44 = vmul.f32 %v464_v60, %v464_v60  ;;  %v641_v5 = vsub.s32 %v638_v11, %v1238_v50  ;;  %v652_v27 = vadd.s32 4294967208, %v1021_v8 }
 0x197   :  { %570 = vperm.xlu0 %705, %v511_v61   ;;  %v497_v45 = vmul.f32 %v481_v42, %v433_v40  ;;  %v648_v32 = vsub.s32 %v645_v16, %v1238_v50  ;;  %v659_v33 = vadd.s32 4294967200, %v1021_v8  ;;  %v666_v39 = vadd.s32 4294967192, %v1021_v8 }
 0x198   :  { %567 = vperm.xlu1 %706, %v510_v1   ;;  %v496_v34 = vmul.f32 %v480_v44, %v432_v43  ;;  %v655_v60 = vsub.s32 %v652_v27, %v1238_v50  ;;  %v680_v43 = vadd.s32 4294967176, %v1021_v8 }
 0x199   :  { %v513_v46 = vsub.f32 0.0, %v497_v45  ;;  %v662_v44 = vsub.s32 %v659_v33, %v1238_v50  ;;  %v673_v45 = vadd.s32 4294967184, %v1021_v8 }
 0x19a   :  { %v512_v6 = vsub.f32 0.0, %v496_v34  ;;  %v683_v23 = vsub.s32 %v680_v43, %v1238_v50 }
 0x19b   :  { %576 = vperm.xlu0 %705, %v513_v46  }
 0x19c   :  { %573 = vperm.xlu1 %706, %v512_v6   ;;  %v669_v6 = vsub.s32 %v666_v39, %v1238_v50 }
 0x1f3   :  { %v532_v18 = vpop.permute.xlu0 %531 }
 0x1f4   :  { %v581_v57 = vrot.slane %v532_v18, %v580_v51 }
 0x1f7   :  { %v541_v54 = vpop.permute.xlu0 %540 }
 0x1f8   :  { %v535_v47 = vpop.permute.xlu1 %534  ;;  %v600_v4 = vrot.slane %v541_v54, %v599_v22 }
 0x1f9   :  { %v586_v49 = vrot.slane %v535_v47, %v585_v24 }
 0x1fb   :  { %v588_v10 = vsel %vm587_vm0, %v586_v49, %v581_v57 }
 0x1fc   :  { %v538_v7 = vpop.permute.xlu1 %537 }
 0x1fd   :  { %v593_v62 = vrot.slane %v538_v7, %v592_v14  ;;  %v676_v7 = vsub.s32 %v673_v45, %v1238_v50 }
 0x1ff   :  { %v595_v26 = vsel %vm594_vm2, %v593_v62, %v588_v10 }
 0x200   :  { %v544_v35 = vpop.permute.xlu1 %543  ;;  %v602_v15 = vsel %vm601_vm3, %v600_v4, %v595_v26 }
 0x201   :  { %v607_v63 = vrot.slane %v544_v35, %v606_v55 }
 0x203   :  { %v609_v9 = vsel %vm608_vm4, %v607_v63, %v602_v15 }
 0x206   :  { %v547_v59 = vpop.permute.xlu0 %546 }
 0x207   :  { %v614_v25 = vrot.slane %v547_v59, %v613_v21 }
 0x209   :  { %v616_v36 = vsel %vm615_vm5, %v614_v25, %v609_v9 }
 0x20a   :  { %v553_v12 = vpop.permute.xlu0 %552 }
 0x20b   :  { %v550_v19 = vpop.permute.xlu1 %549  ;;  %v628_v2 = vrot.slane %v553_v12, %v627_v41 }
 0x20c   :  { %v621_v20 = vrot.slane %v550_v19, %v620_v29 }
 0x20e   :  { %v623_v17 = vsel %vm622_vm6, %v621_v20, %v616_v36  ;;  %v559_v0 = vpop.permute.xlu0 %558 }
 0x20f   :  { %v556_v28 = vpop.permute.xlu1 %555  ;;  %v630_v13 = vsel %vm629_vm7, %v628_v2, %v623_v17  ;;  %v642_v38 = vrot.slane %v559_v0, %v641_v5 }
 0x210   :  { %v635_v31 = vrot.slane %v556_v28, %v634_v30 }
 0x212   :  { %v637_v40 = vsel %vm636_vm8, %v635_v31, %v630_v13  ;;  %v565_v61 = vpop.permute.xlu0 %564 }
 0x213   :  { %v562_v42 = vpop.permute.xlu1 %561  ;;  %v644_v34 = vsel %vm643_vm9, %v642_v38, %v637_v40  ;;  %v656_v46 = vrot.slane %v565_v61, %v655_v60 }
 0x214   :  { %v649_v1 = vrot.slane %v562_v42, %v648_v32 }
 0x216   :  { %v651_v47 = vsel %vm650_vm10, %v649_v1, %v644_v34  ;;  %v571_v48 = vpop.permute.xlu0 %570 }
 0x217   :  { %v568_v18 = vpop.permute.xlu1 %567  ;;  %v658_v14 = vsel %vm657_vm11, %v656_v46, %v651_v47  ;;  %v670_v37 = vrot.slane %v571_v48, %v669_v6 }
 0x218   :  { %v663_v24 = vrot.slane %v568_v18, %v662_v44 }
 0x21a   :  { %v665_v51 = vsel %vm664_vm12, %v663_v24, %v658_v14  ;;  %v577_v52 = vpop.permute.xlu0 %576 }
 0x21b   :  { %v574_v8 = vpop.permute.xlu1 %573  ;;  %v684_v53 = vrot.slane %v577_v52, %v683_v23  ;;  %v672_v49 = vsel %vm671_vm13, %v670_v37, %v665_v51 }
 0x21c   :  { %v677_v54 = vrot.slane %v574_v8, %v676_v7 }
 0x21e   :  { %v679_v62 = vsel %vm678_vm14, %v677_v54, %v672_v49 }
 0x21f   :  { %v686_v55 = vsel %vm685_vm15, %v684_v53, %v679_v62 }
 0x220   :  { %688 = vst [vmem:[#allocation2] sm:$0x1] %v686_v55 }
 0x221   :  { %814 = shalt.err (!%p811_p4)
}
 0x222   :  { %s815_s27 = scalar_lea.hbm %s1285_s3, 16 }
 0x223   :  { %p816_p5 = scmp.ne.s32.totalorder %s1285_s3, %s815_s27  ;;  %p819_p6 = scmp.lt.u32.totalorder %s815_s27, %s1285_s3 }
 0x225   :  { %p821_p7 = pnand %p819_p6, %p816_p5 }
 0x227   :  { %824 = shalt.err (!%p821_p7)
}
 0x228   :  { %698 = dma.vmem_to_hbm [thread:$0]  %s696_s22, 16, %s1285_s3, [#allocation3]  }
 0x229   :  { %825 = dma.done.wait [#allocation3], 16  }
 0x22a   :  { %826 = vsyncadd [#allocation3], 4294967280 }
 0x22b   :  { %702 = vsyncpa [#allocation3], 1 }

</bundles_post_ra>
